<compile_context>
chip_gen: v7x
topology: tpu7x:2x2x1
jax: 0.10.0
libtpu: 0.0.40
codegen_flags: <defaults>
</compile_context>

<pallas_src>
import functools
import math

import jax
import jax.numpy as jnp
from jax import lax
from jax.experimental import pallas as pl
from jax.experimental.pallas import tpu as pltpu


def _attention_kernel(k_ref, q_ref, wk_ref, bk_ref, wq_ref, bq_ref, pw_ref, pb_ref,
                      out_ref, score_ref, *, n_head, hidden_dim):
    """One grid step = `bb` batch elements; all heads fused inside the body."""
    bb, k_len, embed_dim = k_ref.shape
    q_len = q_ref.shape[1]
    out_dim = out_ref.shape[2]

    # Flatten the batch block into the MXU M dim for the per-head projections.
    k2 = k_ref[...].reshape(bb * k_len, embed_dim)      # bf16
    q2 = q_ref[...].reshape(bb * q_len, embed_dim)      # bf16

    acc = jnp.zeros((bb, q_len, out_dim), dtype=jnp.float32)
    for h in range(n_head):                              # static unroll; n_head is small
        # Per-head projections: bf16 x bf16 MXU, f32 accumulate, f32 bias.
        kh = jnp.dot(k2, wk_ref[h], preferred_element_type=jnp.float32) + bk_ref[h]
        qh = jnp.dot(q2, wq_ref[h], preferred_element_type=jnp.float32) + bq_ref[h]
        kh = kh.astype(jnp.bfloat16).reshape(bb, k_len, hidden_dim)   # K == V
        qh = qh.astype(jnp.bfloat16).reshape(bb, q_len, hidden_dim)

        # q · kᵀ, batched over the batch block (contract hidden dim, no transpose).
        s = lax.dot_general(qh, kh,
                            dimension_numbers=(((2,), (2,)), ((0,), (0,))),
                            preferred_element_type=jnp.float32)       # (bb, q_len, k_len)
        s = s - jnp.max(s, axis=-1, keepdims=True)
        e = jnp.exp(s)
        # EUP approximate reciprocal instead of a VALU vector divide.
        p = e * pl.reciprocal(jnp.sum(e, axis=-1, keepdims=True), approx=True)
        score_ref[h] = p.astype(score_ref.dtype)                      # f32 score, exact layout

        # p · V (batched), then fold this head's slice of the output projection into
        # the f32 accumulator (== PyTorch split/cat/proj without a lane concatenate).
        hv = lax.dot_general(p.astype(jnp.bfloat16), kh,
                             dimension_numbers=(((2,), (1,)), ((0,), (0,))),
                             preferred_element_type=jnp.float32)      # (bb, q_len, H)
        ph = jnp.dot(hv.astype(jnp.bfloat16).reshape(bb * q_len, hidden_dim),
                     pw_ref[h], preferred_element_type=jnp.float32)   # (bb*q_len, out_dim)
        acc = acc + ph.reshape(bb, q_len, out_dim)

    out_ref[...] = (acc + pb_ref[...]).astype(out_ref.dtype)          # single store per block


def _pick_batch_block(batch, q_len, k_len):
    """Batch elements per grid step: enough rows to feed the MXU M dim, but keep
    >= 2 'parallel' grid steps when batch >= 2 so both v7x TensorCores get work."""
    target = max(1, 128 // max(q_len, k_len))
    bb = min(target, max(1, batch // 2))
    while batch % bb:          # keep every block full (divisor of batch)
        bb -= 1
    return max(bb, 1)


@functools.partial(jax.jit, static_argnames=("n_head", "hidden_dim", "out_dim"))
def attention_forward(k, q, kparams, *, n_head, hidden_dim, out_dim):
    """Pallas equivalent of Attention.forward (dot_product, eval mode).

    k: (B, k_len, E) float32, q: (B, q_len, E) float32.
    kparams: output of prepare_params() (kernel-layout, bf16 MXU weights).
    Returns (output (B, q_len, out_dim) f32, score (n_head*B, q_len, k_len) f32).
    """
    B, k_len, E = k.shape
    q_len = q.shape[1]
    bb = _pick_batch_block(B, q_len, k_len)

    kernel = functools.partial(_attention_kernel, n_head=n_head, hidden_dim=hidden_dim)

    out_shape = (
        jax.ShapeDtypeStruct((B, q_len, out_dim), jnp.float32),
        jax.ShapeDtypeStruct((n_head, B, q_len, k_len), jnp.float32),
    )

    const3 = lambda i: (0, 0, 0)   # grid-resident weights: never re-DMA'd across grid
    const2 = lambda i: (0, 0)

    grid_spec = pltpu.PrefetchScalarGridSpec(
        num_scalar_prefetch=0,
        grid=(B // bb,),
        in_specs=[
            pl.BlockSpec((bb, k_len, E), lambda i: (i, 0, 0)),          # k (bf16)
            pl.BlockSpec((bb, q_len, E), lambda i: (i, 0, 0)),          # q (bf16)
            pl.BlockSpec((n_head, E, hidden_dim), const3),              # W_k head-major (bf16)
            pl.BlockSpec((n_head, 1, hidden_dim), const3),              # b_k (f32)
            pl.BlockSpec((n_head, E, hidden_dim), const3),              # W_q head-major (bf16)
            pl.BlockSpec((n_head, 1, hidden_dim), const3),              # b_q (f32)
            pl.BlockSpec((n_head, hidden_dim, out_dim), const3),        # proj_w head-major (bf16)
            pl.BlockSpec((1, out_dim), const2),                         # proj_b (f32)
        ],
        out_specs=[
            pl.BlockSpec((bb, q_len, out_dim), lambda i: (i, 0, 0)),           # output
            pl.BlockSpec((n_head, bb, q_len, k_len), lambda i: (0, i, 0, 0)),  # score
        ],
    )

    out, score = pl.pallas_call(
        kernel,
        out_shape=out_shape,
        grid_spec=grid_spec,
        compiler_params=pltpu.CompilerParams(
            dimension_semantics=("parallel",),
            vmem_limit_bytes=32 * 1024 * 1024),
    )(k.astype(jnp.bfloat16), q.astype(jnp.bfloat16),
      kparams["wk"], kparams["bk"], kparams["wq"], kparams["bq"],
      kparams["pw"], kparams["pb"])

    # (n_head, B, q_len, k_len) -> (n_head*B, q_len, k_len): contiguous, free reshape
    # giving the exact PyTorch score layout (row index = h*B + b).
    return out, score.reshape(n_head * B, q_len, k_len)


def prepare_params(params, n_head, hidden_dim):
    """One-time repack of torch-layout nn.Linear params into kernel layout:
    head-major, MXU operands in bf16, biases in f32. Hoisted off the hot path."""
    wk = jnp.asarray(params["wk_w"], jnp.float32)     # (n_head*H, E)
    wq = jnp.asarray(params["wq_w"], jnp.float32)     # (n_head*H, E)
    pw = jnp.asarray(params["proj_w"], jnp.float32)   # (out_dim, n_head*H)
    E = wk.shape[1]
    out_dim = pw.shape[0]
    return {
        "wk": jnp.transpose(wk.reshape(n_head, hidden_dim, E), (0, 2, 1)).astype(jnp.bfloat16),
        "bk": jnp.asarray(params["wk_b"], jnp.float32).reshape(n_head, 1, hidden_dim),
        "wq": jnp.transpose(wq.reshape(n_head, hidden_dim, E), (0, 2, 1)).astype(jnp.bfloat16),
        "bq": jnp.asarray(params["wq_b"], jnp.float32).reshape(n_head, 1, hidden_dim),
        "pw": pw.T.reshape(n_head, hidden_dim, out_dim).astype(jnp.bfloat16),
        "pb": jnp.asarray(params["proj_b"], jnp.float32).reshape(1, out_dim),
    }


def reference_forward(k, q, params, *, n_head, hidden_dim, out_dim):
    """Pure-JAX f32 mirror of the PyTorch forward (dot_product, dropout=0)."""
    B, k_len, E = k.shape
    q_len = q.shape[1]
    kx = (k @ params["wk_w"].T + params["wk_b"]).reshape(B, k_len, n_head, hidden_dim)
    kx = jnp.transpose(kx, (2, 0, 1, 3)).reshape(-1, k_len, hidden_dim)
    qx = (q @ params["wq_w"].T + params["wq_b"]).reshape(B, q_len, n_head, hidden_dim)
    qx = jnp.transpose(qx, (2, 0, 1, 3)).reshape(-1, q_len, hidden_dim)
    score = jax.nn.softmax(jnp.einsum("bqh,bkh->bqk", qx, kx), axis=-1)
    out = jnp.einsum("bqk,bkh->bqh", score, kx)
    out = jnp.concatenate(jnp.split(out, n_head, axis=0), axis=-1)
    out = out @ params["proj_w"].T + params["proj_b"]
    return out, score


def init_params(key, embed_dim, hidden_dim, n_head, out_dim):
    """Deterministic synthetic params with the same shapes as the nn.Module."""
    ks = jax.random.split(key, 6)
    inner = n_head * hidden_dim
    lim_in = 1.0 / math.sqrt(embed_dim)
    lim_h = 1.0 / math.sqrt(inner)
    return {
        "wk_w": jax.random.uniform(ks[0], (inner, embed_dim), jnp.float32, -lim_in, lim_in),
        "wk_b": jax.random.uniform(ks[1], (inner,), jnp.float32, -lim_in, lim_in),
        "wq_w": jax.random.uniform(ks[2], (inner, embed_dim), jnp.float32, -lim_in, lim_in),
        "wq_b": jax.random.uniform(ks[3], (inner,), jnp.float32, -lim_in, lim_in),
        "proj_w": jax.random.uniform(ks[4], (out_dim, inner), jnp.float32, -lim_h, lim_h),
        "proj_b": jax.random.uniform(ks[5], (out_dim,), jnp.float32, -lim_h, lim_h),
    }


if __name__ == "__main__":
    B, k_len, q_len = 4, 8, 8
    embed_dim, n_head = 32, 2
    hidden_dim = embed_dim // n_head   # module default
    out_dim = embed_dim                # module default

    root = jax.random.PRNGKey(0)
    kk, kq, kp = jax.random.split(root, 3)
    k = jax.random.normal(kk, (B, k_len, embed_dim), jnp.float32)
    q = jax.random.normal(kq, (B, q_len, embed_dim), jnp.float32)
    params = init_params(kp, embed_dim, hidden_dim, n_head, out_dim)
    kparams = prepare_params(params, n_head, hidden_dim)   # one-time repack, off the hot path

    out, score = attention_forward(k, q, kparams, n_head=n_head,
                                   hidden_dim=hidden_dim, out_dim=out_dim)
    out, score = jax.block_until_ready((out, score))

    out_ref, score_ref = reference_forward(k, q, params, n_head=n_head,
                                           hidden_dim=hidden_dim, out_dim=out_dim)
    assert out.shape == (B, q_len, out_dim)
    assert score.shape == (n_head * B, q_len, k_len)
    # bf16 MXU operands with f32 accumulation vs the f32 reference: tolerance sized
    # for bf16 rounding (~2^-9 per operand) through the two matmul stages.
    assert jnp.allclose(score, score_ref, rtol=3e-2, atol=3e-2)
    assert jnp.allclose(out, out_ref, rtol=3e-2, atol=3e-2)
    # attention rows should (approximately) sum to 1 despite the EUP approx reciprocal
    assert jnp.allclose(jnp.sum(score, axis=-1), 1.0, atol=1e-2)

    print("KERNEL_OK")
</pallas_src>

<mosaic_0001>
module attributes {stable_mosaic.version = 11 : i64} {
  func.func @_attention_kernel(%arg0: i32, %arg1: memref<2x8x32xbf16, #tpu.memory_space<vmem>>, %arg2: memref<2x8x32xbf16, #tpu.memory_space<vmem>>, %arg3: memref<2x32x16xbf16, #tpu.memory_space<vmem>>, %arg4: memref<2x1x16xf32, #tpu.memory_space<vmem>>, %arg5: memref<2x32x16xbf16, #tpu.memory_space<vmem>>, %arg6: memref<2x1x16xf32, #tpu.memory_space<vmem>>, %arg7: memref<2x16x32xbf16, #tpu.memory_space<vmem>>, %arg8: memref<1x32xf32, #tpu.memory_space<vmem>>, %arg9: memref<2x8x32xf32, #tpu.memory_space<vmem>>, %arg10: memref<2x2x8x8xf32, #tpu.memory_space<vmem>>) attributes {dimension_semantics = [#tpu.dimension_semantics<parallel>], iteration_bounds = array<i64: 2>, scalar_prefetch = 0 : i64, scratch_operands = 0 : i64, tpu.core_type = #tpu.core_type<tc>, window_params = [{transform_indices = @transform_0, window_bounds = array<i64: 2, 8, 32>}, {transform_indices = @transform_1, window_bounds = array<i64: 2, 8, 32>}, {pipeline_mode = #tpu.pipeline_mode<synchronous>, transform_indices = @transform_2, window_bounds = array<i64: 2, 32, 16>}, {pipeline_mode = #tpu.pipeline_mode<synchronous>, transform_indices = @transform_3, window_bounds = array<i64: 2, 1, 16>}, {pipeline_mode = #tpu.pipeline_mode<synchronous>, transform_indices = @transform_4, window_bounds = array<i64: 2, 32, 16>}, {pipeline_mode = #tpu.pipeline_mode<synchronous>, transform_indices = @transform_5, window_bounds = array<i64: 2, 1, 16>}, {pipeline_mode = #tpu.pipeline_mode<synchronous>, transform_indices = @transform_6, window_bounds = array<i64: 2, 16, 32>}, {pipeline_mode = #tpu.pipeline_mode<synchronous>, transform_indices = @transform_7, window_bounds = array<i64: 1, 32>}, {transform_indices = @transform_8, window_bounds = array<i64: 2, 8, 32>}, {transform_indices = @transform_9, window_bounds = array<i64: 2, 2, 8, 8>}]} {
    %c0 = arith.constant 0 : index
    %c0_0 = arith.constant 0 : index
    %c0_1 = arith.constant 0 : index
    %0 = vector.load %arg1[%c0, %c0_0, %c0_1] : memref<2x8x32xbf16, #tpu.memory_space<vmem>>, vector<2x8x32xbf16>
    %1 = vector.shape_cast %0 : vector<2x8x32xbf16> to vector<16x32xbf16>
    %c0_2 = arith.constant 0 : index
    %c0_3 = arith.constant 0 : index
    %c0_4 = arith.constant 0 : index
    %2 = vector.load %arg2[%c0_2, %c0_3, %c0_4] : memref<2x8x32xbf16, #tpu.memory_space<vmem>>, vector<2x8x32xbf16>
    %3 = vector.shape_cast %2 : vector<2x8x32xbf16> to vector<16x32xbf16>
    %cst = arith.constant 0.000000e+00 : f32
    %4 = vector.broadcast %cst : f32 to vector<2x8x32xf32>
    %c0_5 = arith.constant 0 : index
    %c0_6 = arith.constant 0 : index
    %c0_7 = arith.constant 0 : index
    %5 = vector.load %arg3[%c0_5, %c0_6, %c0_7] : memref<2x32x16xbf16, #tpu.memory_space<vmem>>, vector<1x32x16xbf16>
    %6 = vector.shape_cast %5 : vector<1x32x16xbf16> to vector<32x16xbf16>
    %cst_8 = arith.constant dense<0.000000e+00> : vector<16x16xf32>
    %7 = tpu.matmul %1, %6, %cst_8 {dimension_numbers = #tpu.dot_dimension_numbers<[1], [0], [0], [1], [0, 0, 1, 1], [], []>} : vector<16x32xbf16>, vector<32x16xbf16>, vector<16x16xf32> -> vector<16x16xf32>
    %c0_9 = arith.constant 0 : index
    %c0_10 = arith.constant 0 : index
    %c0_11 = arith.constant 0 : index
    %8 = vector.load %arg4[%c0_9, %c0_10, %c0_11] : memref<2x1x16xf32, #tpu.memory_space<vmem>>, vector<1x1x16xf32>
    %9 = vector.shape_cast %8 : vector<1x1x16xf32> to vector<1x16xf32>
    %10 = vector.broadcast %9 : vector<1x16xf32> to vector<16x16xf32>
    %11 = arith.addf %7, %10 : vector<16x16xf32>
    %c0_12 = arith.constant 0 : index
    %c0_13 = arith.constant 0 : index
    %c0_14 = arith.constant 0 : index
    %12 = vector.load %arg5[%c0_12, %c0_13, %c0_14] : memref<2x32x16xbf16, #tpu.memory_space<vmem>>, vector<1x32x16xbf16>
    %13 = vector.shape_cast %12 : vector<1x32x16xbf16> to vector<32x16xbf16>
    %cst_15 = arith.constant dense<0.000000e+00> : vector<16x16xf32>
    %14 = tpu.matmul %3, %13, %cst_15 {dimension_numbers = #tpu.dot_dimension_numbers<[1], [0], [0], [1], [0, 0, 1, 1], [], []>} : vector<16x32xbf16>, vector<32x16xbf16>, vector<16x16xf32> -> vector<16x16xf32>
    %c0_16 = arith.constant 0 : index
    %c0_17 = arith.constant 0 : index
    %c0_18 = arith.constant 0 : index
    %15 = vector.load %arg6[%c0_16, %c0_17, %c0_18] : memref<2x1x16xf32, #tpu.memory_space<vmem>>, vector<1x1x16xf32>
    %16 = vector.shape_cast %15 : vector<1x1x16xf32> to vector<1x16xf32>
    %17 = vector.broadcast %16 : vector<1x16xf32> to vector<16x16xf32>
    %18 = arith.addf %14, %17 : vector<16x16xf32>
    %19 = arith.truncf %11 : vector<16x16xf32> to vector<16x16xbf16>
    %20 = vector.shape_cast %19 : vector<16x16xbf16> to vector<2x8x16xbf16>
    %21 = arith.truncf %18 : vector<16x16xf32> to vector<16x16xbf16>
    %22 = vector.shape_cast %21 : vector<16x16xbf16> to vector<2x8x16xbf16>
    %cst_19 = arith.constant dense<0.000000e+00> : vector<2x8x8xf32>
    %23 = tpu.matmul %22, %20, %cst_19 {dimension_numbers = #tpu.dot_dimension_numbers<[2], [2], [1], [1], [0, 0, 0, 1, 1, 1], [0], [0]>} : vector<2x8x16xbf16>, vector<2x8x16xbf16>, vector<2x8x8xf32> -> vector<2x8x8xf32>
    %cst_20 = arith.constant dense<0xFF800000> : vector<2x8xf32>
    %24 = vector.multi_reduction <maximumf>, %23, %cst_20 [2] : vector<2x8x8xf32> to vector<2x8xf32>
    %25 = vector.shape_cast %24 : vector<2x8xf32> to vector<2x8x1xf32>
    %26 = vector.broadcast %25 : vector<2x8x1xf32> to vector<2x8x8xf32>
    %27 = arith.subf %23, %26 : vector<2x8x8xf32>
    %28 = math.exp %27 : vector<2x8x8xf32>
    %cst_21 = arith.constant dense<0.000000e+00> : vector<2x8xf32>
    %29 = vector.multi_reduction <add>, %28, %cst_21 [2] : vector<2x8x8xf32> to vector<2x8xf32>
    %30 = vector.shape_cast %29 : vector<2x8xf32> to vector<2x8x1xf32>
    %31 = tpu.reciprocal %30 {approx = true} : vector<2x8x1xf32> -> vector<2x8x1xf32>
    %32 = vector.broadcast %31 : vector<2x8x1xf32> to vector<2x8x8xf32>
    %33 = arith.mulf %28, %32 : vector<2x8x8xf32>
    %c0_22 = arith.constant 0 : index
    %c0_23 = arith.constant 0 : index
    %c0_24 = arith.constant 0 : index
    %c0_25 = arith.constant 0 : index
    %34 = vector.load %arg10[%c0_22, %c0_23, %c0_24, %c0_25] : memref<2x2x8x8xf32, #tpu.memory_space<vmem>>, vector<1x2x8x8xf32>
    %35 = vector.shape_cast %34 : vector<1x2x8x8xf32> to vector<2x8x8xf32>
    %36 = vector.shape_cast %33 : vector<2x8x8xf32> to vector<1x2x8x8xf32>
    tpu.vector_store %arg10[%c0_22, %c0_23, %c0_24, %c0_25], %36 {strides = array<i32>} : memref<2x2x8x8xf32, #tpu.memory_space<vmem>>, vector<1x2x8x8xf32>,
    %37 = arith.truncf %33 : vector<2x8x8xf32> to vector<2x8x8xbf16>
    %cst_26 = arith.constant dense<0.000000e+00> : vector<2x8x16xf32>
    %38 = tpu.matmul %37, %20, %cst_26 {dimension_numbers = #tpu.dot_dimension_numbers<[2], [1], [1], [2], [0, 0, 0, 1, 1, 2], [0], [0]>} : vector<2x8x8xbf16>, vector<2x8x16xbf16>, vector<2x8x16xf32> -> vector<2x8x16xf32>
    %39 = arith.truncf %38 : vector<2x8x16xf32> to vector<2x8x16xbf16>
    %40 = vector.shape_cast %39 : vector<2x8x16xbf16> to vector<16x16xbf16>
    %c0_27 = arith.constant 0 : index
    %c0_28 = arith.constant 0 : index
    %c0_29 = arith.constant 0 : index
    %41 = vector.load %arg7[%c0_27, %c0_28, %c0_29] : memref<2x16x32xbf16, #tpu.memory_space<vmem>>, vector<1x16x32xbf16>
    %42 = vector.shape_cast %41 : vector<1x16x32xbf16> to vector<16x32xbf16>
    %cst_30 = arith.constant dense<0.000000e+00> : vector<16x32xf32>
    %43 = tpu.matmul %40, %42, %cst_30 {dimension_numbers = #tpu.dot_dimension_numbers<[1], [0], [0], [1], [0, 0, 1, 1], [], []>} : vector<16x16xbf16>, vector<16x32xbf16>, vector<16x32xf32> -> vector<16x32xf32>
    %44 = vector.shape_cast %43 : vector<16x32xf32> to vector<2x8x32xf32>
    %45 = arith.addf %4, %44 : vector<2x8x32xf32>
    %c1 = arith.constant 1 : index
    %c0_31 = arith.constant 0 : index
    %c0_32 = arith.constant 0 : index
    %46 = vector.load %arg3[%c1, %c0_31, %c0_32] : memref<2x32x16xbf16, #tpu.memory_space<vmem>>, vector<1x32x16xbf16>
    %47 = vector.shape_cast %46 : vector<1x32x16xbf16> to vector<32x16xbf16>
    %cst_33 = arith.constant dense<0.000000e+00> : vector<16x16xf32>
    %48 = tpu.matmul %1, %47, %cst_33 {dimension_numbers = #tpu.dot_dimension_numbers<[1], [0], [0], [1], [0, 0, 1, 1], [], []>} : vector<16x32xbf16>, vector<32x16xbf16>, vector<16x16xf32> -> vector<16x16xf32>
    %c1_34 = arith.constant 1 : index
    %c0_35 = arith.constant 0 : index
    %c0_36 = arith.constant 0 : index
    %49 = vector.load %arg4[%c1_34, %c0_35, %c0_36] : memref<2x1x16xf32, #tpu.memory_space<vmem>>, vector<1x1x16xf32>
    %50 = vector.shape_cast %49 : vector<1x1x16xf32> to vector<1x16xf32>
    %51 = vector.broadcast %50 : vector<1x16xf32> to vector<16x16xf32>
    %52 = arith.addf %48, %51 : vector<16x16xf32>
    %c1_37 = arith.constant 1 : index
    %c0_38 = arith.constant 0 : index
    %c0_39 = arith.constant 0 : index
    %53 = vector.load %arg5[%c1_37, %c0_38, %c0_39] : memref<2x32x16xbf16, #tpu.memory_space<vmem>>, vector<1x32x16xbf16>
    %54 = vector.shape_cast %53 : vector<1x32x16xbf16> to vector<32x16xbf16>
    %cst_40 = arith.constant dense<0.000000e+00> : vector<16x16xf32>
    %55 = tpu.matmul %3, %54, %cst_40 {dimension_numbers = #tpu.dot_dimension_numbers<[1], [0], [0], [1], [0, 0, 1, 1], [], []>} : vector<16x32xbf16>, vector<32x16xbf16>, vector<16x16xf32> -> vector<16x16xf32>
    %c1_41 = arith.constant 1 : index
    %c0_42 = arith.constant 0 : index
    %c0_43 = arith.constant 0 : index
    %56 = vector.load %arg6[%c1_41, %c0_42, %c0_43] : memref<2x1x16xf32, #tpu.memory_space<vmem>>, vector<1x1x16xf32>
    %57 = vector.shape_cast %56 : vector<1x1x16xf32> to vector<1x16xf32>
    %58 = vector.broadcast %57 : vector<1x16xf32> to vector<16x16xf32>
    %59 = arith.addf %55, %58 : vector<16x16xf32>
    %60 = arith.truncf %52 : vector<16x16xf32> to vector<16x16xbf16>
    %61 = vector.shape_cast %60 : vector<16x16xbf16> to vector<2x8x16xbf16>
    %62 = arith.truncf %59 : vector<16x16xf32> to vector<16x16xbf16>
    %63 = vector.shape_cast %62 : vector<16x16xbf16> to vector<2x8x16xbf16>
    %cst_44 = arith.constant dense<0.000000e+00> : vector<2x8x8xf32>
    %64 = tpu.matmul %63, %61, %cst_44 {dimension_numbers = #tpu.dot_dimension_numbers<[2], [2], [1], [1], [0, 0, 0, 1, 1, 1], [0], [0]>} : vector<2x8x16xbf16>, vector<2x8x16xbf16>, vector<2x8x8xf32> -> vector<2x8x8xf32>
    %cst_45 = arith.constant dense<0xFF800000> : vector<2x8xf32>
    %65 = vector.multi_reduction <maximumf>, %64, %cst_45 [2] : vector<2x8x8xf32> to vector<2x8xf32>
    %66 = vector.shape_cast %65 : vector<2x8xf32> to vector<2x8x1xf32>
    %67 = vector.broadcast %66 : vector<2x8x1xf32> to vector<2x8x8xf32>
    %68 = arith.subf %64, %67 : vector<2x8x8xf32>
    %69 = math.exp %68 : vector<2x8x8xf32>
    %cst_46 = arith.constant dense<0.000000e+00> : vector<2x8xf32>
    %70 = vector.multi_reduction <add>, %69, %cst_46 [2] : vector<2x8x8xf32> to vector<2x8xf32>
    %71 = vector.shape_cast %70 : vector<2x8xf32> to vector<2x8x1xf32>
    %72 = tpu.reciprocal %71 {approx = true} : vector<2x8x1xf32> -> vector<2x8x1xf32>
    %73 = vector.broadcast %72 : vector<2x8x1xf32> to vector<2x8x8xf32>
    %74 = arith.mulf %69, %73 : vector<2x8x8xf32>
    %c1_47 = arith.constant 1 : index
    %c0_48 = arith.constant 0 : index
    %c0_49 = arith.constant 0 : index
    %c0_50 = arith.constant 0 : index
    %75 = vector.load %arg10[%c1_47, %c0_48, %c0_49, %c0_50] : memref<2x2x8x8xf32, #tpu.memory_space<vmem>>, vector<1x2x8x8xf32>
    %76 = vector.shape_cast %75 : vector<1x2x8x8xf32> to vector<2x8x8xf32>
    %77 = vector.shape_cast %74 : vector<2x8x8xf32> to vector<1x2x8x8xf32>
    tpu.vector_store %arg10[%c1_47, %c0_48, %c0_49, %c0_50], %77 {strides = array<i32>} : memref<2x2x8x8xf32, #tpu.memory_space<vmem>>, vector<1x2x8x8xf32>,
    %78 = arith.truncf %74 : vector<2x8x8xf32> to vector<2x8x8xbf16>
    %cst_51 = arith.constant dense<0.000000e+00> : vector<2x8x16xf32>
    %79 = tpu.matmul %78, %61, %cst_51 {dimension_numbers = #tpu.dot_dimension_numbers<[2], [1], [1], [2], [0, 0, 0, 1, 1, 2], [0], [0]>} : vector<2x8x8xbf16>, vector<2x8x16xbf16>, vector<2x8x16xf32> -> vector<2x8x16xf32>
    %80 = arith.truncf %79 : vector<2x8x16xf32> to vector<2x8x16xbf16>
    %81 = vector.shape_cast %80 : vector<2x8x16xbf16> to vector<16x16xbf16>
    %c1_52 = arith.constant 1 : index
    %c0_53 = arith.constant 0 : index
    %c0_54 = arith.constant 0 : index
    %82 = vector.load %arg7[%c1_52, %c0_53, %c0_54] : memref<2x16x32xbf16, #tpu.memory_space<vmem>>, vector<1x16x32xbf16>
    %83 = vector.shape_cast %82 : vector<1x16x32xbf16> to vector<16x32xbf16>
    %cst_55 = arith.constant dense<0.000000e+00> : vector<16x32xf32>
    %84 = tpu.matmul %81, %83, %cst_55 {dimension_numbers = #tpu.dot_dimension_numbers<[1], [0], [0], [1], [0, 0, 1, 1], [], []>} : vector<16x16xbf16>, vector<16x32xbf16>, vector<16x32xf32> -> vector<16x32xf32>
    %85 = vector.shape_cast %84 : vector<16x32xf32> to vector<2x8x32xf32>
    %86 = arith.addf %45, %85 : vector<2x8x32xf32>
    %c0_56 = arith.constant 0 : index
    %c0_57 = arith.constant 0 : index
    %87 = vector.load %arg8[%c0_56, %c0_57] : memref<1x32xf32, #tpu.memory_space<vmem>>, vector<1x32xf32>
    %88 = vector.shape_cast %87 : vector<1x32xf32> to vector<1x1x32xf32>
    %89 = vector.broadcast %88 : vector<1x1x32xf32> to vector<2x8x32xf32>
    %90 = arith.addf %86, %89 : vector<2x8x32xf32>
    %c0_58 = arith.constant 0 : index
    %c0_59 = arith.constant 0 : index
    %c0_60 = arith.constant 0 : index
    %91 = vector.load %arg9[%c0_58, %c0_59, %c0_60] : memref<2x8x32xf32, #tpu.memory_space<vmem>>, vector<2x8x32xf32>
    tpu.vector_store %arg9[%c0_58, %c0_59, %c0_60], %90 {strides = array<i32>} : memref<2x8x32xf32, #tpu.memory_space<vmem>>, vector<2x8x32xf32>,
    return
  }
  func.func @transform_0(%arg0: i32) -> (i32, i32, i32) {
    %c0_i32 = arith.constant 0 : i32
    %c0_i32_0 = arith.constant 0 : i32
    %c0_i32_1 = arith.constant 0 : i32
    return %arg0, %c0_i32, %c0_i32_0 : i32, i32, i32
  }
  func.func @transform_1(%arg0: i32) -> (i32, i32, i32) {
    %c0_i32 = arith.constant 0 : i32
    %c0_i32_0 = arith.constant 0 : i32
    %c0_i32_1 = arith.constant 0 : i32
    return %arg0, %c0_i32, %c0_i32_0 : i32, i32, i32
  }
  func.func @transform_2(%arg0: i32) -> (i32, i32, i32) {
    %c0_i32 = arith.constant 0 : i32
    %c0_i32_0 = arith.constant 0 : i32
    %c0_i32_1 = arith.constant 0 : i32
    %c0_i32_2 = arith.constant 0 : i32
    return %c0_i32, %c0_i32_0, %c0_i32_1 : i32, i32, i32
  }
  func.func @transform_3(%arg0: i32) -> (i32, i32, i32) {
    %c0_i32 = arith.constant 0 : i32
    %c0_i32_0 = arith.constant 0 : i32
    %c0_i32_1 = arith.constant 0 : i32
    %c0_i32_2 = arith.constant 0 : i32
    return %c0_i32, %c0_i32_0, %c0_i32_1 : i32, i32, i32
  }
  func.func @transform_4(%arg0: i32) -> (i32, i32, i32) {
    %c0_i32 = arith.constant 0 : i32
    %c0_i32_0 = arith.constant 0 : i32
    %c0_i32_1 = arith.constant 0 : i32
    %c0_i32_2 = arith.constant 0 : i32
    return %c0_i32, %c0_i32_0, %c0_i32_1 : i32, i32, i32
  }
  func.func @transform_5(%arg0: i32) -> (i32, i32, i32) {
    %c0_i32 = arith.constant 0 : i32
    %c0_i32_0 = arith.constant 0 : i32
    %c0_i32_1 = arith.constant 0 : i32
    %c0_i32_2 = arith.constant 0 : i32
    return %c0_i32, %c0_i32_0, %c0_i32_1 : i32, i32, i32
  }
  func.func @transform_6(%arg0: i32) -> (i32, i32, i32) {
    %c0_i32 = arith.constant 0 : i32
    %c0_i32_0 = arith.constant 0 : i32
    %c0_i32_1 = arith.constant 0 : i32
    %c0_i32_2 = arith.constant 0 : i32
    return %c0_i32, %c0_i32_0, %c0_i32_1 : i32, i32, i32
  }
  func.func @transform_7(%arg0: i32) -> (i32, i32) {
    %c0_i32 = arith.constant 0 : i32
    %c0_i32_0 = arith.constant 0 : i32
    %c0_i32_1 = arith.constant 0 : i32
    return %c0_i32, %c0_i32_0 : i32, i32
  }
  func.func @transform_8(%arg0: i32) -> (i32, i32, i32) {
    %c0_i32 = arith.constant 0 : i32
    %c0_i32_0 = arith.constant 0 : i32
    %c0_i32_1 = arith.constant 0 : i32
    return %arg0, %c0_i32, %c0_i32_0 : i32, i32, i32
  }
  func.func @transform_9(%arg0: i32) -> (i32, i32, i32, i32) {
    %c0_i32 = arith.constant 0 : i32
    %c0_i32_0 = arith.constant 0 : i32
    %c0_i32_1 = arith.constant 0 : i32
    %c0_i32_2 = arith.constant 0 : i32
    return %c0_i32, %arg0, %c0_i32_0, %c0_i32_1 : i32, i32, i32, i32
  }
}

</mosaic_0001>

<bundles_post_ra>
// kernel: attention_forward.1
= control target key start
LH: loop header
LB: loop body
LE: loop exit
PB: predicated region body
PF: predicated region fallthrough
CT: control target
= control target key end

     0   :  { %s2105_s0 = inlined_call_operand.vmem [shape: bf16[4,8,32], index: 0, kind: input, shape index: {}]   ;;  %s2106_s1 = inlined_call_operand.vmem [shape: bf16[4,8,32], index: 1, kind: input, shape index: {}]   ;;  %s2107_s2 = inlined_call_operand.vmem [shape: bf16[2,32,16], index: 2, kind: input, shape index: {}]   ;;  %s2108_s3 = inlined_call_operand.vmem [shape: f32[2,1,16], index: 3, kind: input, shape index: {}]   ;;  %s2109_s4 = inlined_call_operand.vmem [shape: bf16[2,32,16], index: 4, kind: input, shape index: {}]   ;;  %s2110_s5 = inlined_call_operand.vmem [shape: f32[2,1,16], index: 5, kind: input, shape index: {}]   ;;  %s2111_s6 = inlined_call_operand.vmem [shape: bf16[2,16,32], index: 6, kind: input, shape index: {}]   ;;  %s2112_s7 = inlined_call_operand.vmem [shape: f32[1,32], index: 7, kind: input, shape index: {}]   ;;  %s2113_s8 = inlined_call_operand.hbm [shape: f32[4,8,32], index: 8, kind: output, shape index: {0}]   ;;  %s2114_s9 = inlined_call_operand.hbm [shape: f32[2,4,8,8], index: 9, kind: output, shape index: {1}]  }
   0x1   :  { %2116 = sst [smem:[#allocation10_spill]] %s2105_s0 }
   0x2   :  { %2117 = sst [smem:[#allocation11_spill]] %s2106_s1 }
   0x3   :  { %15 = vsyncpa [#allocation3], 0 }
   0x4   :  { %17 = vsyncpa [#allocation3 + $0x1], 0 }
   0x5   :  { %18 = vsyncpa [#allocation5], 0 }
   0x6   :  { %20 = vsyncpa [#allocation5 + $0x1], 0  ;;  %s1826_s30 = smov 0   ;;  %s1828_s10 = smov 0  }
   0x7   :  { %s1830_s11 = smov 0   ;;  %s1832_s12 = smov 0  }
   0x8 LB: > { %s1847_s13 = sadd.s32 4294967295, %s1762_s12   ;;  %s1398_s14 = sadd.s32 4294967294, %s1762_s12   ;;  %s1762_s12 = sphi %s1832_s12, %s2127_s12   ;;  %s1758_s11 = sphi %s1830_s11, %s2126_s11   ;;  %s1754_s10 = sphi %s1828_s10, %s2125_s10   ;;  %s1750_s30 = sphi %s1826_s30, %s2124_s30  }
   0x9   : > { %s1851_s15 = sadd.s32 1, %s1762_s12   ;;  %s211_s16 = sadd.s32 1, %s1758_s11 }
   0xa   : > { %s208_s17 = ssub.s32 %s1762_s12, %s1851_s15  ;;  %p221_p0 = scmp.ne.s32.totalorder %s1758_s11, %s1754_s10 }
   0xb   : > { %p209_p1 = scmp.eq.s32.totalorder %s208_s17, 0  ;;  %p222_p2 = scmp.eq.s32.totalorder %s1847_s13, 1 }
   0xc   : > { %p227_p3 = scmp.ne.s32.totalorder %s1754_s10, %s1750_s30  ;;  %p228_p4 = scmp.eq.s32.totalorder %s1398_s14, 1 }
   0xd   : > { %s1862_s18 = scalar_select %p209_p1, %s1758_s11, %s211_s16  }
   0xe   : > { %p1864_p5 = por %p222_p2, %p221_p0  ;;  %p1868_p6 = por %p228_p4, %p227_p3 }
   0xf   : > { %p1401_p7 = scmp.ge.s32.totalorder %s1762_s12, 1  ;;  %p308_p8 = scmp.lt.s32.totalorder %s1762_s12, 3 }
  0x11   : > { %p309_p9 = pnand %p1401_p7, %p308_p8 }
  0x12   : > { %v1668_v0 = vld [vmem:[%s2107_s2] sm:$0xff] (!%p309_p9)   ;;  %v1764_v1 = vmov (!%p309_p9), 0.0   ;;  %v1669_v2 = vld [vmem:[%s2107_s2 + $0x8] sm:$0xff] (!%p309_p9)   ;;  %vm1765_vm0 = vmmov (!%p309_p9), 0   ;;  %s1404_s27 = sshll.u32 (!%p309_p9), %s1847_s13, 1  ;;  %vm401_vm1 = vcmask (!%p309_p9), 261120  }
  0x13   : > { %312 = sbr.rel (%p309_p9) target bundleno = 2211 (0x8a3), region = 52  ;;  %1515 = vmatprep.subr.bf16.mxu0 (!%p309_p9), %v1764_v1  ;;  %1523 = vmatprep.subr.bf16.mxu1 (!%p309_p9), %v1764_v1  ;;  %v1670_v3 = vld [vmem:[%s2109_s4] sm:$0xff] (!%p309_p9)   ;;  %p355_p10 = scmp.lt.s32.totalorder (!%p309_p9), %s1404_s27, 3  ;;  %v1672_v4 = vld [vmem:[%s2109_s4 + $0x8] sm:$0xff] (!%p309_p9)   ;;  %vm530_vm2 = vcmask (!%p309_p9), 130048   ;;  %vm653_vm3 = vcmask (!%p309_p9), 1043456  }
  0x14   : > { %1516 = vmatpush3.bf16.msra.mxu0 (!%p309_p9), %v1668_v0  ;;  %1519 = vmatprep.mubr.msk.bf16.mxu0 (!%p309_p9), %vm1765_vm0, %v1764_v1  ;;  %s2120_s0 = sld [smem:[#allocation10_spill]] (!%p309_p9)  ;;  %s2121_s1 = sld [smem:[#allocation11_spill]] (!%p309_p9)  ;;  %v1408_v7 = vld [vmem:[%s2108_s3] ss:$0 sm:$0xff] (!%p309_p9)  ;;  %vm623_vm4 = vcmask (!%p309_p9), 64512   ;;  %v1674_v56 = vld [vmem:[%s2107_s2 + $0x10] sm:$0xff] (!%p309_p9)  }
  0x15   : > { %1517 = vmatprep.subr.bf16.mxu0 (!%p309_p9), %v1764_v1  ;;  %1527 = vmatprep.mubr.msk.bf16.mxu1 (!%p309_p9), %vm1765_vm0, %v1764_v1  ;;  %v1413_v13 = vld [vmem:[%s2110_s5] ss:$0 sm:$0xff] (!%p309_p9)  ;;  %s1940_s29 = sand.u32 (!%p309_p9), 1, %s1754_s10   ;;  %v1676_v58 = vld [vmem:[%s2107_s2 + $0x18] sm:$0xff] (!%p309_p9)  }
  0x16   : > { %1524 = vmatpush3.bf16.msra.mxu1 (!%p309_p9), %v1670_v3  ;;  %v1675_v59 = vld [vmem:[%s2111_s6] sm:$0xff] (!%p309_p9)   ;;  %s1402_s26 = sshll.u32 (!%p309_p9), %s1940_s29, 4 }
  0x17   : > { %1525 = vmatprep.subr.bf16.mxu1 (!%p309_p9), %v1764_v1 }
  0x18   : > { %1518 = vmatpush3.bf16.msra.mxu0 (!%p309_p9), %v1669_v2  ;;  %v1677_v2 = vld [vmem:[%s2109_s4 + $0x10] sm:$0xff] (!%p309_p9)  }
  0x19   : > { %1531 = vmatprep.subr.bf16.mxu0 (!%p309_p9), %v1764_v1 }
  0x1a   : > { %s2129_s27 = smov (!%p355_p10, %s1404_s27), 3  ;;  %1526 = vmatpush3.bf16.msra.mxu1 %v1672_v4 }
  0x1b   : > { %s1405_s14 = sshll.u32 %s2129_s27, 2  ;;  %1537 = vmatprep.subr.bf16.mxu1 %v1764_v1  ;;  %s1766_s27 = smov [#allocation2]  }
  0x1c   : > { %s358_s21 = scalar_lea.vmem %s2120_s0, %s1405_s14  ;;  %s364_s24 = scalar_lea.vmem %s2121_s1, %s1405_s14 }
  0x1d   : > { %v1902_v5 = vld [vmem:[%s358_s21] sm:$0xff]   ;;  %s1403_s14 = sshll.u32 %s1940_s29, 5  ;;  %s2115_s21 = sshll.u32 %s1847_s13, 8 }
  0x1e   : > { %v1905_v6 = vld [vmem:[%s364_s24] sm:$0xff]   ;;  %1520 = vmatmul.mubr.msk.bf16.vlgmr.msra.gmra.mrb[0].mxu0 %vm401_vm1, %v1902_v5  ;;  %s1943_s16 = scalar_lea.vmem [#allocation4], %s1403_s14  ;;  %s346_s14 = scalar_lea.vmem [#allocation2], %s1402_s26 }
  0x1f   : > { %1528 = vmatmul.mubr.msk.bf16.vlgmr.msra.gmra.mrb[0].mxu1 %vm401_vm1, %v1905_v6  ;;  %1533 = vmatprep.mubr.msk.bf16.mxu0 %vm1765_vm0, %v1764_v1  ;;  %s1247_s17 = sshll.u32 %s346_s14, 4  ;;  %s2037_s24 = scalar_lea.hbm %s2113_s8, %s2115_s21  ;;  %s2039_s17 = int_to_ptr.vmem [resolvable:$true] %s1247_s17 }
  0x20   : > { %1539 = vmatprep.mubr.msk.bf16.mxu1 %vm1765_vm0, %v1764_v1  ;;  %s1696_s26 = scalar_lea.vmem %s2039_s17, 256  ;;  %s1700_s28 = sshll.u32 %s1766_s27, 4  ;;  %s1701_s28 = int_to_ptr.vmem [resolvable:$false] %s1700_s28 }
  0x21   : > { %p1697_p11 = scmp.ne.s32.totalorder %s2039_s17, %s1696_s26  ;;  %s1702_s22 = scalar_lea.vmem %s1701_s28, 512 }
  0x22   : > { %p1703_p0 = scmp.lt.s32.totalorder %s2039_s17, %s1701_s28  ;;  %p1704_p1 = scmp.lt.s32.totalorder %s1702_s22, %s1696_s26 }
  0x23   : > { %p1698_p12 = pnand %p1697_p11, %p1864_p5 }
  0x24   : > { %p1705_p2 = por %p1704_p1, %p1703_p0 }
  0x25   : > { %p1699_p13 = pneg %p1698_p12 }
  0x27   : > { %p1706_p3 = pnand %p1705_p2, %p1699_p13 }
  0xf1   : > { %v439_v8 = vpop.f32.mrb[0].mxu0 }
  0xf2   : > { %v440_v9 = vadd.f32 %v1408_v7, %v439_v8  ;;  %v1521_v10 = vpop.f32.mrb[1].mxu0  ;;  %v511_v11 = vpop.f32.mrb[0].mxu1 }
  0xf3   : > { %v442_v12 = vpop.f32.mrb[2].mxu0  ;;  %v1529_v14 = vpop.f32.mrb[1].mxu1  ;;  %v512_v22 = vadd.f32 %v1413_v13, %v511_v11 }
  0xf4   : > { %v1471_v15 = vpack.c.bf16 %v440_v9, %v440_v9  ;;  %v443_v16 = vadd.f32 %v1408_v7, %v442_v12  ;;  %v1522_v17 = vpop.f32.mrb[3].mxu0  ;;  %v514_v18 = vpop.f32.mrb[2].mxu1  ;;  %v1434_v9 = vld [vmem:[%s2108_s3 + $0x1] ss:$0 sm:$0xff] }
  0xf5   : > { %v1530_v19 = vpop.f32.mrb[3].mxu1  ;;  %v1473_v24 = vpack.c.bf16 %v512_v22, %v512_v22  ;;  %v515_v25 = vadd.f32 %v1413_v13, %v514_v18 }
  0xf6   : > { %v535_v20 = vsel %vm530_vm2, %v1471_v15, 0  ;;  %v1472_v21 = vpack.c.bf16 %v443_v16, %v443_v16  ;;  %v654_v26 = vsel %vm653_vm3, %v1471_v15, 0 }
  0xf7   : > { %1532 = vmatpush3.bf16.xpose.msra.mxu0 %v535_v20  ;;  %v1474_v27 = vpack.c.bf16 %v515_v25, %v515_v25 }
  0xf8   : > { %v581_v23 = vsel %vm530_vm2, %v1472_v21, 0  ;;  %1543 = vmatprep.subr.bf16.mxu0 %v1764_v1  ;;  %v699_v28 = vsel %vm653_vm3, %v1472_v21, 0 }
  0xf9   : > { %1538 = vmatpush3.bf16.xpose.msra.mxu1 %v581_v23  ;;  %v1443_v23 = vld [vmem:[%s2110_s5 + $0x1] ss:$0 sm:$0xff] }
  0xfa   : > { %1549 = vmatprep.subr.bf16.mxu1 %v1764_v1 }
  0xfe   : > { %1534 = vmatmul.mubr.msk.bf16.vlgmr.msra.gmra.mrb[4].mxu0 %vm530_vm2, %v1473_v24 }
  0xff   : > { %1544 = vmatpush3.bf16.msra.mxu0 %v654_v26  ;;  %1545 = vmatprep.mubr.msk.bf16.mxu0 %vm1765_vm0, %v1764_v1 }
 0x100   : > { %1540 = vmatmul.mubr.msk.bf16.vlgmr.msra.gmra.mrb[4].mxu1 %vm530_vm2, %v1474_v27  ;;  %1555 = vmatprep.subr.bf16.mxu0 %v1764_v1 }
 0x101   : > { %1550 = vmatpush3.bf16.msra.mxu1 %v699_v28  ;;  %1551 = vmatprep.mubr.msk.bf16.mxu1 %vm1765_vm0, %v1764_v1 }
 0x102   : > { %1561 = vmatprep.subr.bf16.mxu1 %v1764_v1 }
 0x1d1   : > { %v571_v29 = vpop.f32.mrb[4].mxu0 }
 0x1d2   : > { %v1535_v30 = vpop.f32.mrb[5].mxu0  ;;  %v624_v31 = vsel %vm623_vm4, %v571_v29, -inf }
 0x1d3   : > { %v617_v32 = vpop.f32.mrb[4].mxu1  ;;  %625 = vmax.xlane.f32.xlu0 %v624_v31  ;;  %v574_v33 = vpop.f32.mrb[6].mxu0 }
 0x1d4   : > { %v1536_v34 = vpop.f32.mrb[7].mxu0  ;;  %v1541_v35 = vpop.f32.mrb[5].mxu1  ;;  %v627_v38 = vsel %vm623_vm4, %v617_v32, -inf }
 0x1d5   : > { %v620_v36 = vpop.f32.mrb[6].mxu1 }
 0x1d6   : > { %v1542_v37 = vpop.f32.mrb[7].mxu1 }
 0x1d7   : > { %628 = vmax.xlane.f32.xlu0 %v627_v38 }
 0x260   : > { %v626_v39 = vpop.xlane.xlu0 %625 }
 0x261   : > { %v630_v40 = vsub.f32 %v571_v29, %v626_v39 }
 0x263   : > { %v632_v41 = vmul.f32 1.442695, %v630_v40 }
 0x264   : > { %v629_v42 = vpop.xlane.xlu0 %628 }
 0x265   : > { %1680 = vpow2.f32 %v632_v41  ;;  %v631_v43 = vsub.f32 %v617_v32, %v629_v42 }
 0x267   : > { %v634_v44 = vmul.f32 1.442695, %v631_v43 }
 0x269   : > { %1682 = vpow2.f32 %v634_v44 }
 0x26f   : > { %v1681_v45 = vpop.eup %1680 }
 0x270   : > { %v636_v46 = vsel %vm623_vm4, %v1681_v45, 0.0 }
 0x271   : > { %637 = vadd.xlane.f32.xlu1 %v636_v46 }
 0x273   : > { %v1683_v47 = vpop.eup %1682 }
 0x274   : > { %v639_v48 = vsel %vm623_vm4, %v1683_v47, 0.0 }
 0x275   : > { %640 = vadd.xlane.f32.xlu1 %v639_v48 }
 0x2fe   : > { %v638_v49 = vpop.xlane.xlu1 %637 }
 0x2ff   : > { %1684 = vrcp.f32 %v638_v49 }
 0x302   : > { %v641_v50 = vpop.xlane.xlu1 %640 }
 0x303   : > { %1686 = vrcp.f32 %v641_v50 }
 0x309   : > { %v1685_v51 = vpop.eup %1684 }
 0x30a   : > { %v644_v52 = vmul.f32 %v1685_v51, %v1681_v45 }
 0x30c   : > { %v648_v53 = vpack.c.bf16 %v644_v52, %v644_v52  ;;  %646 = vst.msk [vmem:[%s1943_s16] sm:$0xff] %vm623_vm4, %v644_v52 }
 0x30d   : > { %v1687_v54 = vpop.eup %1686 }
 0x30e   : > { %v645_v55 = vmul.f32 %v1687_v54, %v1683_v47  ;;  %1546 = vmatmul.mubr.msk.bf16.vlgmr.msra.gmra.mrb[8].mxu0 %vm623_vm4, %v648_v53 }
 0x30f   : > { %1557 = vmatprep.mubr.msk.bf16.mxu0 %vm1765_vm0, %v1764_v1  ;;  %1556 = vmatpush3.bf16.msra.mxu0 %v1675_v59  ;;  %v1679_v59 = vld [vmem:[%s2111_s6 + $0x8] sm:$0xff]  }
 0x310   : > { %v649_v57 = vpack.c.bf16 %v645_v55, %v645_v55  ;;  %647 = vst.msk [vmem:[%s1943_s16 + $0x8] sm:$0xff] %vm623_vm4, %v645_v55  ;;  %1569 = vmatprep.subr.bf16.mxu0 %v1764_v1 }
 0x312   : > { %1552 = vmatmul.mubr.msk.bf16.vlgmr.msra.gmra.mrb[8].mxu1 %vm623_vm4, %v649_v57 }
 0x313   : > { %1562 = vmatpush3.bf16.msra.mxu1 %v1674_v56  ;;  %1565 = vmatprep.mubr.msk.bf16.mxu1 %vm1765_vm0, %v1764_v1 }
 0x314   : > { %1563 = vmatprep.subr.bf16.mxu1 %v1764_v1 }
 0x317   : > { %1564 = vmatpush3.bf16.msra.mxu1 %v1676_v58 }
 0x318   : > { %1577 = vmatprep.subr.bf16.mxu1 %v1764_v1 }
 0x31a   : > { %1566 = vmatmul.mubr.msk.bf16.vlgmr.msra.gmra.mrb[12].mxu1 %vm401_vm1, %v1902_v5  ;;  %v1678_v5 = vld [vmem:[%s2109_s4 + $0x18] sm:$0xff]  }
 0x31b   : > { %1579 = vmatprep.mubr.msk.bf16.mxu1 %vm1765_vm0, %v1764_v1 }
 0x3e1   : > { %v690_v60 = vpop.f32.mrb[8].mxu0 }
 0x3e2   : > { %v1547_v61 = vpop.f32.mrb[9].mxu0 }
 0x3e3   : > { %v693_v62 = vpop.f32.mrb[10].mxu0 }
 0x3e4   : > { %v1548_v63 = vpop.f32.mrb[11].mxu0 }
 0x3e5   : > { %v735_v0 = vpop.f32.mrb[8].mxu1 }
 0x3e6   : > { %v1475_v3 = vpack.c.bf16 %v735_v0, %v690_v60  ;;  %v1553_v4 = vpop.f32.mrb[9].mxu1 }
 0x3e7   : > { %v738_v7 = vpop.f32.mrb[10].mxu1 }
 0x3e8   : > { %v1554_v8 = vpop.f32.mrb[11].mxu1  ;;  %1558 = vmatmul.mubr.msk.bf16.vlgmr.msra.gmra.mrb[12].mxu0 %vm530_vm2, %v1475_v3 }
 0x3e9   : > { %1570 = vmatpush3.bf16.msra.mxu0 %v1677_v2  ;;  %1573 = vmatprep.mubr.msk.bf16.mxu0 %vm1765_vm0, %v1764_v1 }
 0x3ea   : > { %1571 = vmatprep.subr.bf16.mxu0 %v1764_v1 }
 0x3ed   : > { %1572 = vmatpush3.bf16.msra.mxu0 %v1678_v5  ;;  %v861_v10 = vpop.f32.mrb[12].mxu1 }
 0x3ee   : > { %1583 = vmatprep.subr.bf16.mxu0 %v1764_v1  ;;  %v862_v11 = vadd.f32 %v1434_v9, %v861_v10  ;;  %v1567_v12 = vpop.f32.mrb[13].mxu1 }
 0x3ef   : > { %v864_v13 = vpop.f32.mrb[14].mxu1 }
 0x3f0   : > { %1574 = vmatmul.mubr.msk.bf16.vlgmr.msra.gmra.mrb[16].mxu0 %vm401_vm1, %v1905_v6  ;;  %v1476_v14 = vpack.c.bf16 %v862_v11, %v862_v11  ;;  %v865_v15 = vadd.f32 %v1434_v9, %v864_v13  ;;  %v1568_v16 = vpop.f32.mrb[15].mxu1 }
 0x3f1   : > { %1585 = vmatprep.mubr.msk.bf16.mxu0 %vm1765_vm0, %v1764_v1 }
 0x3f2   : > { %v950_v17 = vsel %vm530_vm2, %v1476_v14, 0  ;;  %v1477_v18 = vpack.c.bf16 %v865_v15, %v865_v15  ;;  %v1068_v31 = vsel %vm653_vm3, %v1476_v14, 0 }
 0x3f3   : > { %1578 = vmatpush3.bf16.xpose.msra.mxu1 %v950_v17 }
 0x3f4   : > { %v996_v6 = vsel %vm530_vm2, %v1477_v18, 0  ;;  %1589 = vmatprep.subr.bf16.mxu1 %v1764_v1  ;;  %v1113_v33 = vsel %vm653_vm3, %v1477_v18, 0 }
 0x3f6   : > { %1584 = vmatpush3.bf16.xpose.msra.mxu0 %v996_v6 }
 0x3f7   : > { %1595 = vmatprep.subr.bf16.mxu0 %v1764_v1 }
 0x4bb   : > { %v1993_v19 = vpop.f32.mrb[12].mxu0 }
 0x4bc   : > { %v1559_v20 = vpop.f32.mrb[13].mxu0 }
 0x4bd   : > { %v1995_v21 = vpop.f32.mrb[14].mxu0 }
 0x4be   : > { %v1560_v22 = vpop.f32.mrb[15].mxu0 }
 0x4c3   : > { %v927_v24 = vpop.f32.mrb[16].mxu0 }
 0x4c4   : > { %v928_v25 = vadd.f32 %v1443_v23, %v927_v24  ;;  %v1575_v26 = vpop.f32.mrb[17].mxu0 }
 0x4c5   : > { %v930_v27 = vpop.f32.mrb[18].mxu0 }
 0x4c6   : > { %v1478_v28 = vpack.c.bf16 %v928_v25, %v928_v25  ;;  %v931_v29 = vadd.f32 %v1443_v23, %v930_v27  ;;  %v1576_v30 = vpop.f32.mrb[19].mxu0 }
 0x4c8   : > { %v1479_v32 = vpack.c.bf16 %v931_v29, %v931_v29  ;;  %1580 = vmatmul.mubr.msk.bf16.vlgmr.msra.gmra.mrb[16].mxu1 %vm530_vm2, %v1478_v28 }
 0x4c9   : > { %1590 = vmatpush3.bf16.msra.mxu1 %v1068_v31  ;;  %1591 = vmatprep.mubr.msk.bf16.mxu1 %vm1765_vm0, %v1764_v1 }
 0x4ca   : > { %1586 = vmatmul.mubr.msk.bf16.vlgmr.msra.gmra.mrb[20].mxu0 %vm530_vm2, %v1479_v32  ;;  %1601 = vmatprep.subr.bf16.mxu1 %v1764_v1 }
 0x4cb   : > { %1596 = vmatpush3.bf16.msra.mxu0 %v1113_v33  ;;  %1597 = vmatprep.mubr.msk.bf16.mxu0 %vm1765_vm0, %v1764_v1 }
 0x59b   : > { %v986_v34 = vpop.f32.mrb[16].mxu1 }
 0x59c   : > { %v1581_v35 = vpop.f32.mrb[17].mxu1  ;;  %v1038_v36 = vsel %vm623_vm4, %v986_v34, -inf }
 0x59d   : > { %1039 = vmax.xlane.f32.xlu0 %v1038_v36  ;;  %v989_v37 = vpop.f32.mrb[18].mxu1  ;;  %v1032_v38 = vpop.f32.mrb[20].mxu0 }
 0x59e   : > { %v1582_v39 = vpop.f32.mrb[19].mxu1  ;;  %v1587_v40 = vpop.f32.mrb[21].mxu0  ;;  %v1041_v41 = vsel %vm623_vm4, %v1032_v38, -inf }
 0x59f   : > { %1042 = vmax.xlane.f32.xlu1 %v1041_v41  ;;  %v1035_v42 = vpop.f32.mrb[22].mxu0 }
 0x5a0   : > { %v1588_v43 = vpop.f32.mrb[23].mxu0 }
 0x62a   : > { %v1040_v44 = vpop.xlane.xlu0 %1039 }
 0x62b   : > { %v1044_v45 = vsub.f32 %v986_v34, %v1040_v44 }
 0x62c   : > { %v1043_v46 = vpop.xlane.xlu1 %1042 }
 0x62d   : > { %v1046_v47 = vmul.f32 1.442695, %v1044_v45  ;;  %v1045_v48 = vsub.f32 %v1032_v38, %v1043_v46 }
 0x62f   : > { %1688 = vpow2.f32 %v1046_v47  ;;  %v1048_v49 = vmul.f32 1.442695, %v1045_v48 }
 0x631   : > { %1690 = vpow2.f32 %v1048_v49 }
 0x639   : > { %v1689_v50 = vpop.eup %1688 }
 0x63a   : > { %v1050_v51 = vsel %vm623_vm4, %v1689_v50, 0.0 }
 0x63b   : > { %v1691_v52 = vpop.eup %1690  ;;  %1051 = vadd.xlane.f32.xlu0 %v1050_v51 }
 0x63c   : > { %v1053_v53 = vsel %vm623_vm4, %v1691_v52, 0.0 }
 0x63d   : > { %1054 = vadd.xlane.f32.xlu1 %v1053_v53 }
 0x6c8   : > { %v1052_v54 = vpop.xlane.xlu0 %1051 }
 0x6c9   : > { %1692 = vrcp.f32 %v1052_v54 }
 0x6ca   : > { %v1055_v55 = vpop.xlane.xlu1 %1054 }
 0x6cb   : > { %1694 = vrcp.f32 %v1055_v55 }
 0x6d3   : > { %v1693_v56 = vpop.eup %1692 }
 0x6d4   : > { %v1058_v57 = vmul.f32 %v1693_v56, %v1689_v50 }
 0x6d5   : > { %v1695_v58 = vpop.eup %1694 }
 0x6d6   : > { %v1059_v60 = vmul.f32 %v1695_v58, %v1691_v52  ;;  %v1063_v61 = vpack.c.bf16 %v1058_v57, %v1058_v57  ;;  %1453 = vst.msk [vmem:[%s1943_s16 + $0x10] sm:$0xff] %vm623_vm4, %v1058_v57 }
 0x6d8   : > { %1592 = vmatmul.mubr.msk.bf16.vlgmr.msra.gmra.mrb[20].mxu1 %vm623_vm4, %v1063_v61  ;;  %v1064_v62 = vpack.c.bf16 %v1059_v60, %v1059_v60  ;;  %1454 = vst.msk [vmem:[%s1943_s16 + $0x18] sm:$0xff] %vm623_vm4, %v1059_v60 }
 0x6d9   : > { %1602 = vmatpush3.bf16.msra.mxu1 %v1679_v59  ;;  %1603 = vmatprep.mubr.msk.bf16.mxu1 %vm1765_vm0, %v1764_v1  ;;  %v1462_v1 = vld [vmem:[%s2112_s7] ss:$0 sm:$0xff] }
 0x6da   : > { %1598 = vmatmul.mubr.msk.bf16.vlgmr.msra.gmra.mrb[24].mxu0 %vm623_vm4, %v1064_v62 }
 0x7ab   : > { %v1104_v63 = vpop.f32.mrb[20].mxu1 }
 0x7ac   : > { %v1593_v0 = vpop.f32.mrb[21].mxu1 }
 0x7ad   : > { %v1107_v2 = vpop.f32.mrb[22].mxu1  ;;  %v1149_v3 = vpop.f32.mrb[24].mxu0 }
 0x7ae   : > { %v1480_v4 = vpack.c.bf16 %v1149_v3, %v1104_v63  ;;  %v1594_v7 = vpop.f32.mrb[23].mxu1  ;;  %v1599_v8 = vpop.f32.mrb[25].mxu0 }
 0x7af   : > { %v1152_v5 = vpop.f32.mrb[26].mxu0 }
 0x7b0   : > { %v1600_v9 = vpop.f32.mrb[27].mxu0  ;;  %1604 = vmatmul.mubr.msk.bf16.vlgmr.msra.gmra.mrb[24].mxu1 %vm530_vm2, %v1480_v4 }
 0x883   : > { %v1208_v10 = vpop.f32.mrb[24].mxu1 }
 0x884   : > { %v1215_v11 = vadd.f32 %v1208_v10, %v1993_v19  ;;  %v1605_v12 = vpop.f32.mrb[25].mxu1 }
 0x885   : > { %v1211_v13 = vpop.f32.mrb[26].mxu1 }
 0x886   : > { %v1224_v14 = vadd.f32 %v1462_v1, %v1215_v11  ;;  %v1216_v15 = vadd.f32 %v1211_v13, %v1995_v21  ;;  %v1606_v16 = vpop.f32.mrb[27].mxu1 }
 0x888   : > { %1226 = vst.msk [vmem:[%s346_s14] sm:$0xff] %vm401_vm1, %v1224_v14  ;;  %v1225_v17 = vadd.f32 %v1462_v1, %v1216_v15 }
 0x88a   : > { %1227 = vst.msk [vmem:[%s346_s14 + $0x8] sm:$0xff] %vm401_vm1, %v1225_v17 }
 0x88b   : > { %1709 = shalt.err (!%p1706_p3)
}
 0x88c   : > { %s1710_s14 = scalar_lea.hbm %s2037_s24, 256  ;;  %s1714_s27 = scalar_lea.hbm %s2113_s8, 512 }
 0x88d   : > { %p1711_p4 = scmp.ne.s32.totalorder %s2037_s24, %s1710_s14  ;;  %p1715_p9 = scmp.lt.u32.totalorder %s2037_s24, %s2113_s8 }
 0x88e   : > { %p1716_p10 = scmp.lt.u32.totalorder %s1714_s27, %s1710_s14  ;;  %p1718_p12 = scmp.lt.u32.totalorder %s1710_s14, %s2037_s24 }
 0x88f   : > { %p1712_p7 = pnand %p1711_p4, %p1864_p5 }
 0x890   : > { %p1717_p11 = por %p1716_p10, %p1715_p9 }
 0x891   : > { %p1713_p8 = pneg %p1712_p7 }
 0x892   : > { %p1719_p13 = por %p1718_p12, %p1717_p11 }
 0x894   : > { %p1720_p0 = pnand %p1719_p13, %p1713_p8 }
 0x896   : > { %1723 = shalt.err (!%p1720_p0)
}
 0x897   : > { %s1767_s26 = smov 128   ;;  %s1768_s22 = smov 8  }
 0x898   : > { %s2122_s21 = scalar_lea.sflag [#allocation3], %s1940_s29  ;;  %s1234_s23 = scalar_lea.sflag [#allocation5], %s1940_s29 }
 0x899   : > { %1607 = dma.vmem_to_hbm [thread:$0]  (%p1864_p5), %s2039_s17, 256, %s2037_s24, %s2122_s21, %s1767_s26, %s1767_s26, %s1768_s22  }
 0x89a   : > { %s2123_s25 = sshll.u32 %s1847_s13, 8  ;;  %s1279_s0 = sshll.u32 %s1943_s16, 4  ;;  %s1280_s0 = int_to_ptr.vmem [resolvable:$true] %s1279_s0 }
 0x89b   : > { %s1262_s14 = scalar_lea.hbm %s2114_s9, %s2123_s25  ;;  %s1769_s1 = smov 256  }
 0x89c   : > { %1608 = sst [smem:[#allocation7]] (%p1864_p5), %s1769_s1  ;;  %s1770_s29 = smov 512  }
 0x89d   : > { %1609 = sst [smem:[#allocation7 + $0x1]] (%p1864_p5), %s1770_s29  ;;  %s1771_s13 = smov 2  }
 0x89e   : > { %1610 = sst [smem:[#allocation7 + $0x2]] (%p1864_p5), %s1771_s13  ;;  %s1772_s17 = smov 128  }
 0x89f   : > { %1611 = sst [smem:[#allocation7 + $0x3]] (%p1864_p5), %s1772_s17  ;;  %s1773_s24 = smov 8  }
 0x8a0   : > { %1612 = sst [smem:[#allocation7 + $0x4]] (%p1864_p5), %s1772_s17  ;;  %s1774_s26 = smov [#allocation6]  }
 0x8a1   : > { %1613 = sst [smem:[#allocation7 + $0x5]] (%p1864_p5), %s1773_s24  ;;  %s1775_s16 = smov 0  }
 0x8a2   : > { %1614 = dma.general (%p1864_p5), %s1280_s0, 512, %s1262_s14, %s1234_s23, %s1774_s26, [#allocation7], %s1775_s16, 0  }
 0x8a3 PF: > { %p1624_p1 = scmp.ge.s32.totalorder %s1762_s12, 2  ;;  %s1307_s1 = sand.u32 1, %s1750_s30  }
 0x8a4   : > { %s1308_s22 = scalar_lea.sflag [#allocation3], %s1307_s1 }
 0x8a5   : > { %p1618_p2 = pnand %p1624_p1, %p1868_p6 }
 0x8a7   : > { %1741 = dma.done.wait (!%p1618_p2), %s1308_s22, 256  }
 0x8a8   : > { %1743 = vsyncadd (!%p1618_p2), %s1308_s22, 4294967040  ;;  %s1317_s21 = scalar_lea.sflag [#allocation5], %s1307_s1 }
 0x8a9   : > { %1745 = dma.done.wait (!%p1618_p2), %s1317_s21, 512  }
 0x8aa   : > { %1747 = vsyncadd (!%p1618_p2), %s1317_s21, 4294966784  ;;  %p23_p5 = scmp.ge.s32.totalorder %s1851_s15, 4   ;;  %s2124_s30 = smov %s1754_s10 }
 0x8ab   : > { %s2125_s10 = smov %s1758_s11  ;;  %s2126_s11 = smov %s1862_s18 }
 0x8ac   : > { %s2127_s12 = smov %s1851_s15  ;;  %25 = sbr.rel (!%p23_p5) target bundleno = 8 (0x8), region = 118 }
 0x8b3   :  { %1322 = vsyncpa [#allocation3], 1 }
 0x8b4   :  { %1324 = vsyncpa [#allocation3 + $0x1], 1 }
 0x8b5   :  { %1325 = vsyncpa [#allocation5], 1 }
 0x8b6   :  { %1327 = vsyncpa [#allocation5 + $0x1], 1 }

</bundles_post_ra>
